<compile_context>
chip_gen: v7x
topology: tpu7x:2x2x1
jax: 0.10.0
libtpu: 0.0.40
codegen_flags: <defaults>
</compile_context>

<pallas_src>
import jax
import jax.numpy as jnp
from jax.experimental import pallas as pl
from jax.experimental.pallas import tpu as pltpu


def _conv1x1_in_lrelu_kernel(x_ref, w_ref, b_ref, o_ref):
    # x_ref: (Nb, Cin, HW)   w_ref: (Cout, Cin)   b_ref: (Cout, 1)
    # o_ref: (Nb, Cout, HW)
    w_bf = w_ref[...].astype(jnp.bfloat16)          # (Cout, Cin), MXU-native
    b = b_ref[...].astype(jnp.float32)              # (Cout, 1)

    nb = x_ref.shape[0]
    for i in range(nb):                             # static unroll, Nb is small
        xi = x_ref[i].astype(jnp.bfloat16)          # (Cin, HW) lane-dense

        # 1x1 conv == channel matmul; HW stays on the lane axis.
        y = jnp.dot(w_bf, xi, preferred_element_type=jnp.float32)   # (Cout, HW)
        y = y + b                                   # bias (cancels in the norm, kept for fidelity)

        # InstanceNorm2d(affine=False): per (n, c) over spatial axis,
        # biased variance, eps = 1e-5 (PyTorch defaults).  All in f32.
        mean = jnp.mean(y, axis=-1, keepdims=True)                  # (Cout, 1)
        cent = y - mean
        var = jnp.mean(cent * cent, axis=-1, keepdims=True)
        y_n = cent * jax.lax.rsqrt(var + 1e-5)

        # LeakyReLU(negative_slope=0.2)
        o_ref[i] = jnp.where(y_n >= 0.0, y_n, 0.2 * y_n).astype(o_ref.dtype)


def _pick_samples_per_step(n, c_in, c_out, hw, itemsize=4, budget_bytes=20 << 20):
    """Largest divisor Nb of N whose per-step VMEM footprint fits the budget.

    Footprint per sample ~= double-buffered input (2*Cin*HW) + double-buffered
    output (2*Cout*HW) + f32 temporaries (~4*Cout*HW).
    """
    per_sample = (2 * c_in + 2 * c_out + 4 * c_out) * hw * itemsize
    nb = max(1, min(n, budget_bytes // max(per_sample, 1)))
    while n % nb:
        nb -= 1
    return nb


def conv1x1_layer(x_nchw, weight, bias):
    """Forward pass of Conv1x1Layer.

    Args:
      x_nchw: (N, C_in, H, W) float32
      weight: (C_out, C_in) float32  (nn.Conv2d weight squeezed from (C_out, C_in, 1, 1))
      bias:   (C_out,)      float32
    Returns:
      (N, C_out, H, W) float32
    """
    N, C_in, H, W = x_nchw.shape
    C_out = weight.shape[0]
    HW = H * W

    # Free reshapes: NCHW -> (N, Cin, HW) and back.  No HBM transposes.
    x_k = x_nchw.reshape(N, C_in, HW)
    b_k = bias.reshape(C_out, 1)

    Nb = _pick_samples_per_step(N, C_in, C_out, HW)

    out_k = pl.pallas_call(
        _conv1x1_in_lrelu_kernel,
        out_shape=jax.ShapeDtypeStruct((N, C_out, HW), x_nchw.dtype),
        grid_spec=pltpu.PrefetchScalarGridSpec(
            num_scalar_prefetch=0,
            grid=(N // Nb,),
            in_specs=[
                pl.BlockSpec((Nb, C_in, HW), lambda n: (n, 0, 0)),
                pl.BlockSpec((C_out, C_in), lambda n: (0, 0)),
                pl.BlockSpec((C_out, 1), lambda n: (0, 0)),
            ],
            out_specs=pl.BlockSpec((Nb, C_out, HW), lambda n: (n, 0, 0)),
        ),
        compiler_params=pltpu.CompilerParams(
            dimension_semantics=("parallel",),
            vmem_limit_bytes=32 * 1024 * 1024,
        ),
    )(x_k, weight, b_k)

    return out_k.reshape(N, C_out, H, W)


def _reference(x_nchw, weight, bias):
    # Pure-JAX reference (f32) of the same forward pass.
    y = jnp.einsum("oc,nchw->nohw", weight, x_nchw) + bias[None, :, None, None]
    mean = jnp.mean(y, axis=(2, 3), keepdims=True)
    var = jnp.mean((y - mean) ** 2, axis=(2, 3), keepdims=True)
    y_n = (y - mean) * jax.lax.rsqrt(var + 1e-5)
    return jnp.where(y_n >= 0.0, y_n, 0.2 * y_n)


if __name__ == "__main__":
    key = jax.random.PRNGKey(0)
    k_x, k_w, k_b = jax.random.split(key, 3)

    N, C_in, C_out, H, W = 2, 4, 8, 16, 16

    x = jax.random.normal(k_x, (N, C_in, H, W), dtype=jnp.float32)

    # Deterministic parameter init mimicking nn.Conv2d default
    # (U(-1/sqrt(fan_in), 1/sqrt(fan_in)) for kernel_size=1).
    fan_in = C_in
    bound = 1.0 / (fan_in ** 0.5)
    weight = jax.random.uniform(k_w, (C_out, C_in), jnp.float32, -bound, bound)
    bias = jax.random.uniform(k_b, (C_out,), jnp.float32, -bound, bound)

    out = conv1x1_layer(x, weight, bias)
    jax.block_until_ready(out)

    assert out.shape == (N, C_out, H, W), out.shape
    assert out.dtype == jnp.float32

    # Loose tolerance: kernel uses bf16 matmul operands (f32 accumulation/norm).
    ref = _reference(x, weight, bias)
    max_err = float(jnp.max(jnp.abs(out - ref)))
    assert max_err < 5e-2, f"max abs error vs reference: {max_err}"

    print("KERNEL_OK")
</pallas_src>

<mosaic_0001>
module attributes {stable_mosaic.version = 11 : i64} {
  func.func @_conv1x1_in_lrelu_kernel(%arg0: i32, %arg1: memref<2x4x256xf32, #tpu.memory_space<vmem>>, %arg2: memref<8x4xf32, #tpu.memory_space<vmem>>, %arg3: memref<8x1xf32, #tpu.memory_space<vmem>>, %arg4: memref<2x8x256xf32, #tpu.memory_space<vmem>>) attributes {dimension_semantics = [#tpu.dimension_semantics<parallel>], iteration_bounds = array<i64: 1>, scalar_prefetch = 0 : i64, scratch_operands = 0 : i64, tpu.core_type = #tpu.core_type<tc>, window_params = [{transform_indices = @transform_0, window_bounds = array<i64: 2, 4, 256>}, {pipeline_mode = #tpu.pipeline_mode<synchronous>, transform_indices = @transform_1, window_bounds = array<i64: 8, 4>}, {pipeline_mode = #tpu.pipeline_mode<synchronous>, transform_indices = @transform_2, window_bounds = array<i64: 8, 1>}, {transform_indices = @transform_3, window_bounds = array<i64: 2, 8, 256>}]} {
    %c0 = arith.constant 0 : index
    %c0_0 = arith.constant 0 : index
    %0 = vector.load %arg2[%c0, %c0_0] : memref<8x4xf32, #tpu.memory_space<vmem>>, vector<8x4xf32>
    %1 = arith.truncf %0 : vector<8x4xf32> to vector<8x4xbf16>
    %c0_1 = arith.constant 0 : index
    %c0_2 = arith.constant 0 : index
    %2 = vector.load %arg3[%c0_1, %c0_2] : memref<8x1xf32, #tpu.memory_space<vmem>>, vector<8x1xf32>
    %c0_3 = arith.constant 0 : index
    %c0_4 = arith.constant 0 : index
    %c0_5 = arith.constant 0 : index
    %3 = vector.load %arg1[%c0_3, %c0_4, %c0_5] : memref<2x4x256xf32, #tpu.memory_space<vmem>>, vector<1x4x256xf32>
    %4 = vector.shape_cast %3 : vector<1x4x256xf32> to vector<4x256xf32>
    %5 = arith.truncf %4 : vector<4x256xf32> to vector<4x256xbf16>
    %cst = arith.constant dense<0.000000e+00> : vector<8x256xf32>
    %6 = tpu.matmul %1, %5, %cst {dimension_numbers = #tpu.dot_dimension_numbers<[1], [0], [0], [1], [0, 0, 1, 1], [], []>} : vector<8x4xbf16>, vector<4x256xbf16>, vector<8x256xf32> -> vector<8x256xf32>
    %7 = vector.broadcast %2 : vector<8x1xf32> to vector<8x256xf32>
    %8 = arith.addf %6, %7 : vector<8x256xf32>
    %cst_6 = arith.constant dense<0.000000e+00> : vector<8xf32>
    %9 = vector.multi_reduction <add>, %8, %cst_6 [1] : vector<8x256xf32> to vector<8xf32>
    %10 = vector.shape_cast %9 : vector<8xf32> to vector<8x1xf32>
    %cst_7 = arith.constant 2.560000e+02 : f32
    %11 = vector.broadcast %cst_7 : f32 to vector<8x1xf32>
    %12 = arith.divf %10, %11 : vector<8x1xf32>
    %13 = vector.broadcast %12 : vector<8x1xf32> to vector<8x256xf32>
    %14 = arith.subf %8, %13 : vector<8x256xf32>
    %15 = arith.mulf %14, %14 : vector<8x256xf32>
    %cst_8 = arith.constant dense<0.000000e+00> : vector<8xf32>
    %16 = vector.multi_reduction <add>, %15, %cst_8 [1] : vector<8x256xf32> to vector<8xf32>
    %17 = vector.shape_cast %16 : vector<8xf32> to vector<8x1xf32>
    %cst_9 = arith.constant 2.560000e+02 : f32
    %18 = vector.broadcast %cst_9 : f32 to vector<8x1xf32>
    %19 = arith.divf %17, %18 : vector<8x1xf32>
    %cst_10 = arith.constant 9.99999974E-6 : f32
    %20 = vector.broadcast %cst_10 : f32 to vector<8x1xf32>
    %21 = arith.addf %19, %20 : vector<8x1xf32>
    %22 = math.rsqrt %21 : vector<8x1xf32>
    %23 = vector.broadcast %22 : vector<8x1xf32> to vector<8x256xf32>
    %24 = arith.mulf %14, %23 : vector<8x256xf32>
    %cst_11 = arith.constant 0.000000e+00 : f32
    %25 = vector.broadcast %cst_11 : f32 to vector<8x256xf32>
    %26 = arith.cmpf oge, %24, %25 : vector<8x256xf32>
    %cst_12 = arith.constant 2.000000e-01 : f32
    %27 = vector.broadcast %cst_12 : f32 to vector<8x256xf32>
    %28 = arith.mulf %27, %24 : vector<8x256xf32>
    %29 = arith.select %26, %24, %28 : vector<8x256xi1>, vector<8x256xf32>
    %c0_13 = arith.constant 0 : index
    %c0_14 = arith.constant 0 : index
    %c0_15 = arith.constant 0 : index
    %30 = vector.load %arg4[%c0_13, %c0_14, %c0_15] : memref<2x8x256xf32, #tpu.memory_space<vmem>>, vector<1x8x256xf32>
    %31 = vector.shape_cast %30 : vector<1x8x256xf32> to vector<8x256xf32>
    %32 = vector.shape_cast %29 : vector<8x256xf32> to vector<1x8x256xf32>
    tpu.vector_store %arg4[%c0_13, %c0_14, %c0_15], %32 {strides = array<i32>} : memref<2x8x256xf32, #tpu.memory_space<vmem>>, vector<1x8x256xf32>,
    %c1 = arith.constant 1 : index
    %c0_16 = arith.constant 0 : index
    %c0_17 = arith.constant 0 : index
    %33 = vector.load %arg1[%c1, %c0_16, %c0_17] : memref<2x4x256xf32, #tpu.memory_space<vmem>>, vector<1x4x256xf32>
    %34 = vector.shape_cast %33 : vector<1x4x256xf32> to vector<4x256xf32>
    %35 = arith.truncf %34 : vector<4x256xf32> to vector<4x256xbf16>
    %cst_18 = arith.constant dense<0.000000e+00> : vector<8x256xf32>
    %36 = tpu.matmul %1, %35, %cst_18 {dimension_numbers = #tpu.dot_dimension_numbers<[1], [0], [0], [1], [0, 0, 1, 1], [], []>} : vector<8x4xbf16>, vector<4x256xbf16>, vector<8x256xf32> -> vector<8x256xf32>
    %37 = vector.broadcast %2 : vector<8x1xf32> to vector<8x256xf32>
    %38 = arith.addf %36, %37 : vector<8x256xf32>
    %cst_19 = arith.constant dense<0.000000e+00> : vector<8xf32>
    %39 = vector.multi_reduction <add>, %38, %cst_19 [1] : vector<8x256xf32> to vector<8xf32>
    %40 = vector.shape_cast %39 : vector<8xf32> to vector<8x1xf32>
    %cst_20 = arith.constant 2.560000e+02 : f32
    %41 = vector.broadcast %cst_20 : f32 to vector<8x1xf32>
    %42 = arith.divf %40, %41 : vector<8x1xf32>
    %43 = vector.broadcast %42 : vector<8x1xf32> to vector<8x256xf32>
    %44 = arith.subf %38, %43 : vector<8x256xf32>
    %45 = arith.mulf %44, %44 : vector<8x256xf32>
    %cst_21 = arith.constant dense<0.000000e+00> : vector<8xf32>
    %46 = vector.multi_reduction <add>, %45, %cst_21 [1] : vector<8x256xf32> to vector<8xf32>
    %47 = vector.shape_cast %46 : vector<8xf32> to vector<8x1xf32>
    %cst_22 = arith.constant 2.560000e+02 : f32
    %48 = vector.broadcast %cst_22 : f32 to vector<8x1xf32>
    %49 = arith.divf %47, %48 : vector<8x1xf32>
    %cst_23 = arith.constant 9.99999974E-6 : f32
    %50 = vector.broadcast %cst_23 : f32 to vector<8x1xf32>
    %51 = arith.addf %49, %50 : vector<8x1xf32>
    %52 = math.rsqrt %51 : vector<8x1xf32>
    %53 = vector.broadcast %52 : vector<8x1xf32> to vector<8x256xf32>
    %54 = arith.mulf %44, %53 : vector<8x256xf32>
    %cst_24 = arith.constant 0.000000e+00 : f32
    %55 = vector.broadcast %cst_24 : f32 to vector<8x256xf32>
    %56 = arith.cmpf oge, %54, %55 : vector<8x256xf32>
    %cst_25 = arith.constant 2.000000e-01 : f32
    %57 = vector.broadcast %cst_25 : f32 to vector<8x256xf32>
    %58 = arith.mulf %57, %54 : vector<8x256xf32>
    %59 = arith.select %56, %54, %58 : vector<8x256xi1>, vector<8x256xf32>
    %c1_26 = arith.constant 1 : index
    %c0_27 = arith.constant 0 : index
    %c0_28 = arith.constant 0 : index
    %60 = vector.load %arg4[%c1_26, %c0_27, %c0_28] : memref<2x8x256xf32, #tpu.memory_space<vmem>>, vector<1x8x256xf32>
    %61 = vector.shape_cast %60 : vector<1x8x256xf32> to vector<8x256xf32>
    %62 = vector.shape_cast %59 : vector<8x256xf32> to vector<1x8x256xf32>
    tpu.vector_store %arg4[%c1_26, %c0_27, %c0_28], %62 {strides = array<i32>} : memref<2x8x256xf32, #tpu.memory_space<vmem>>, vector<1x8x256xf32>,
    return
  }
  func.func @transform_0(%arg0: i32) -> (i32, i32, i32) {
    %c0_i32 = arith.constant 0 : i32
    %c0_i32_0 = arith.constant 0 : i32
    %c0_i32_1 = arith.constant 0 : i32
    return %arg0, %c0_i32, %c0_i32_0 : i32, i32, i32
  }
  func.func @transform_1(%arg0: i32) -> (i32, i32) {
    %c0_i32 = arith.constant 0 : i32
    %c0_i32_0 = arith.constant 0 : i32
    %c0_i32_1 = arith.constant 0 : i32
    return %c0_i32, %c0_i32_0 : i32, i32
  }
  func.func @transform_2(%arg0: i32) -> (i32, i32) {
    %c0_i32 = arith.constant 0 : i32
    %c0_i32_0 = arith.constant 0 : i32
    %c0_i32_1 = arith.constant 0 : i32
    return %c0_i32, %c0_i32_0 : i32, i32
  }
  func.func @transform_3(%arg0: i32) -> (i32, i32, i32) {
    %c0_i32 = arith.constant 0 : i32
    %c0_i32_0 = arith.constant 0 : i32
    %c0_i32_1 = arith.constant 0 : i32
    return %arg0, %c0_i32, %c0_i32_0 : i32, i32, i32
  }
}

</mosaic_0001>

<bundles_post_ra>
// kernel: tpu_custom_call.1
= control target key start
LH: loop header
LB: loop body
LE: loop exit
PB: predicated region body
PF: predicated region fallthrough
CT: control target
= control target key end

     0   :  { %vm34_vm0 = vcmask 1041408   ;;  %v242_v6 = vmov 0   ;;  %s294_s0 = inlined_call_operand.vmem [shape: f32[2,4,256], index: 0, kind: input, shape index: {}]   ;;  %s295_s1 = inlined_call_operand.vmem [shape: f32[8,4], index: 1, kind: input, shape index: {}]   ;;  %s296_s2 = inlined_call_operand.vmem [shape: f32[8,1], index: 2, kind: input, shape index: {}]   ;;  %s297_s3 = inlined_call_operand.hbm [shape: f32[2,8,256], index: 3, kind: output, shape index: {}]  }
   0x1   :  { %v19_v0 = vld [vmem:[%s294_s0] sm:$0xff]  ;;  %v204_v1 = vld [vmem:[%s294_s0 + $0x8] sm:$0xff]  ;;  %73 = vmatprep.mubr.bf16.mxu0 %v242_v6 }
   0x2   :  { %v21_v2 = vcombine.high %v19_v0, %v19_v0  ;;  %v110_v3 = vcombine.high %v204_v1, %v204_v1  ;;  %v23_v4 = vpack.c.bf16 %v19_v0, %v19_v0  ;;  %v112_v5 = vpack.c.bf16 %v204_v1, %v204_v1  ;;  %v18_v7 = vld [vmem:[%s296_s2] sm:$0xff] }
   0x3   :  { %8 = vsyncpa [#allocation3], 0  ;;  %152 = vmatprep.mubr.bf16.mxu1 %v242_v6  ;;  %v16_v8 = vld [vmem:[%s295_s1] sm:$0xff]  ;;  %211 = vset.pattern.permute.xlu0 %v242_v6  ;;  %vm30_vm1 = vcmask 31744   ;;  %s243_s0 = smov [#allocation2]  }
   0x4   :  { %v24_v9 = vpack.c.bf16 %v21_v2, %v21_v2  ;;  %v113_v10 = vpack.c.bf16 %v110_v3, %v110_v3  ;;  %v36_v11 = vsel %vm34_vm0, %v23_v4, 0  ;;  %v115_v12 = vsel %vm34_vm0, %v112_v5, 0  ;;  %27 = vperm.xlu0 %211, %v18_v7   ;;  %s191_s1 = sshll.u32 %s243_s0, 4  ;;  %s192_s1 = int_to_ptr.vmem [resolvable:$true] %s191_s1 }
   0x5   :  { %v17_v13 = vpack.c.bf16 %v16_v8, %v16_v8  ;;  %s218_s2 = scalar_lea.vmem %s192_s1, 512  ;;  %p223_p1 = scmp.lt.s32.totalorder %s192_s1, %s192_s1 }
   0x6   :  { %202 = vmatprep.subr.msk.bf16.mxu0 %vm34_vm0, %v24_v9  ;;  %205 = vmatprep.subr.msk.bf16.mxu1 %vm34_vm0, %v113_v10  ;;  %p219_p0 = scmp.ne.s32.totalorder %s192_s1, %s218_s2  ;;  %p224_p2 = scmp.lt.s32.totalorder %s218_s2, %s218_s2 }
   0x7   :  { %42 = vmatpush1.bf16.msra.mxu0 %v36_v11  ;;  %121 = vmatpush1.bf16.msra.mxu1 %v115_v12 }
   0x8   :  { %p225_p3 = por %p224_p2, %p223_p1 }
   0xa   :  { %203 = vmatmul.mubr.msk.bf16.vlgmr.msra.gmra.mrb[0].mxu0 %vm30_vm1, %v17_v13  ;;  %206 = vmatmul.mubr.msk.bf16.vlgmr.msra.gmra.mrb[0].mxu1 %vm30_vm1, %v17_v13  ;;  %p226_p4 = pnand %p225_p3, %p219_p0 }
  0x83   :  { %v28_v14 = vpop.permute.xlu0 %27 }
  0xdd   :  { %v75_v15 = vpop.f32.mrb[0].mxu0  ;;  %v154_v16 = vpop.f32.mrb[0].mxu1 }
  0xde   :  { %v76_v17 = vadd.f32 %v75_v15, %v28_v14  ;;  %v155_v18 = vadd.f32 %v154_v16, %v28_v14  ;;  %v77_v19 = vpop.f32.mrb[1].mxu0  ;;  %v156_v20 = vpop.f32.mrb[1].mxu1 }
  0xdf   :  { %v78_v21 = vadd.f32 %v77_v19, %v28_v14  ;;  %v157_v22 = vadd.f32 %v156_v20, %v28_v14  ;;  %v79_v23 = vpop.f32.mrb[2].mxu0  ;;  %v158_v24 = vpop.f32.mrb[2].mxu1 }
  0xe0   :  { %v80_v25 = vpop.f32.mrb[3].mxu0  ;;  %v159_v26 = vpop.f32.mrb[3].mxu1 }
  0xe1   :  { %v161_v27 = vadd.f32 %v157_v22, %v155_v18  ;;  %v82_v28 = vadd.f32 %v78_v21, %v76_v17 }
  0xe3   :  { %162 = vadd.xlane.f32.xlu1 %v161_v27  ;;  %83 = vadd.xlane.f32.xlu0 %v82_v28 }
 0x170   :  { %v163_v29 = vpop.xlane.xlu1 %162  ;;  %v84_v30 = vpop.xlane.xlu0 %83 }
 0x171   :  { %v164_v31 = vmul.f32 0.00390625, %v163_v29  ;;  %v86_v32 = vmul.f32 0.00390625, %v84_v30 }
 0x173   :  { %v165_v33 = vsub.f32 %v155_v18, %v164_v31  ;;  %v166_v34 = vsub.f32 %v157_v22, %v164_v31  ;;  %v87_v35 = vsub.f32 %v76_v17, %v86_v32  ;;  %v88_v36 = vsub.f32 %v78_v21, %v86_v32 }
 0x175   :  { %v89_v37 = vmul.f32 %v87_v35, %v87_v35  ;;  %v90_v38 = vmul.f32 %v88_v36, %v88_v36  ;;  %v167_v40 = vmul.f32 %v165_v33, %v165_v33  ;;  %v168_v41 = vmul.f32 %v166_v34, %v166_v34 }
 0x177   :  { %v91_v39 = vadd.f32 %v90_v38, %v89_v37  ;;  %v169_v42 = vadd.f32 %v168_v41, %v167_v40 }
 0x179   :  { %92 = vadd.xlane.f32.xlu1 %v91_v39 }
 0x17d   :  { %170 = vadd.xlane.f32.xlu1 %v169_v42 }
 0x206   :  { %v93_v43 = vpop.xlane.xlu1 %92 }
 0x207   :  { %v94_v44 = vmul.f32 0.00390625, %v93_v43 }
 0x209   :  { %v95_v45 = vadd.f32 1e-05, %v94_v44 }
 0x20a   :  { %v171_v46 = vpop.xlane.xlu1 %170 }
 0x20b   :  { %214 = vrsqrt.f32 %v95_v45  ;;  %v172_v47 = vmul.f32 0.00390625, %v171_v46 }
 0x20d   :  { %v173_v48 = vadd.f32 1e-05, %v172_v47 }
 0x20f   :  { %216 = vrsqrt.f32 %v173_v48 }
 0x215   :  { %v215_v49 = vpop.eup %214 }
 0x216   :  { %v97_v50 = vmul.f32 %v215_v49, %v87_v35  ;;  %v98_v51 = vmul.f32 %v215_v49, %v88_v36 }
 0x218   :  { %vm99_vm2 = vcmp.ge.f32.partialorder %v97_v50, 0.0  ;;  %vm100_vm3 = vcmp.ge.f32.partialorder %v98_v51, 0.0  ;;  %v101_v52 = vmul.f32 0.2, %v97_v50  ;;  %v102_v53 = vmul.f32 0.2, %v98_v51 }
 0x219   :  { %v217_v54 = vpop.eup %216 }
 0x21a   :  { %v175_v55 = vmul.f32 %v217_v54, %v165_v33  ;;  %v176_v56 = vmul.f32 %v217_v54, %v166_v34  ;;  %v103_v57 = vsel %vm99_vm2, %v97_v50, %v101_v52  ;;  %v104_v58 = vsel %vm100_vm3, %v98_v51, %v102_v53 }
 0x21b   :  { %105 = vst [vmem:[#allocation2] sm:$0xff] %v103_v57  ;;  %106 = vst [vmem:[#allocation2 + $0x8] sm:$0xff] %v104_v58 }
 0x21c   :  { %vm177_vm4 = vcmp.ge.f32.partialorder %v175_v55, 0.0  ;;  %vm178_vm5 = vcmp.ge.f32.partialorder %v176_v56, 0.0  ;;  %v179_v59 = vmul.f32 0.2, %v175_v55  ;;  %v180_v60 = vmul.f32 0.2, %v176_v56 }
 0x21e   :  { %v181_v61 = vsel %vm177_vm4, %v175_v55, %v179_v59  ;;  %v182_v62 = vsel %vm178_vm5, %v176_v56, %v180_v60 }
 0x21f   :  { %184 = vst [vmem:[#allocation2 + $0x10] sm:$0xff] %v181_v61  ;;  %185 = vst [vmem:[#allocation2 + $0x18] sm:$0xff] %v182_v62 }
 0x220   :  { %229 = shalt.err (!%p226_p4)
}
 0x221   :  { %s230_s22 = scalar_lea.hbm %s297_s3, 512 }
 0x222   :  { %p231_p5 = scmp.ne.s32.totalorder %s297_s3, %s230_s22  ;;  %p234_p6 = scmp.lt.u32.totalorder %s230_s22, %s297_s3 }
 0x224   :  { %p236_p7 = pnand %p234_p6, %p231_p5 }
 0x226   :  { %239 = shalt.err (!%p236_p7)
}
 0x227   :  { %s244_s27 = smov 256   ;;  %s245_s28 = smov 16  }
 0x228   :  { %197 = dma.vmem_to_hbm [thread:$0]  %s192_s1, 512, %s297_s3, [#allocation3], %s244_s27, %s244_s27, %s245_s28  }
 0x229   :  { %240 = dma.done.wait [#allocation3], 512  }
 0x22a   :  { %241 = vsyncadd [#allocation3], 4294966784 }
 0x22b   :  { %201 = vsyncpa [#allocation3], 1 }

</bundles_post_ra>
